<compile_context>
chip_gen: v5e
topology: v5e:2x2
jax: 0.10.0
libtpu: 0.0.40
codegen_flags: <defaults>
</compile_context>

<pallas_src>
import jax
import jax.numpy as jnp
from jax.experimental import pallas as pl
from jax.experimental.pallas import tpu as pltpu

NEG_SLOPE = 0.2
BN_EPS = 1e-5


# ------------------------------ Pallas kernel -------------------------------

def _build_patches(patch_ref, get_row, l_in, c_in, stride, pad, batch):
    """In-kernel im2col into a VMEM scratch patch buffer.

    patch_ref: (l_out*batch, k*c_in).  Row t*batch + b, column block
    k*c_in:(k+1)*c_in holds the input at padded position stride*t + k for batch
    element b.  Every slot is written exactly once (data or an explicit zero
    block for padded taps), so no full-buffer zero fill is needed.
    """
    k_taps = patch_ref.shape[1] // c_in
    l_out = patch_ref.shape[0] // batch
    zero_blk = jnp.zeros((batch, c_in), patch_ref.dtype)
    for t in range(l_out):
        for k in range(k_taps):
            src = t * stride + k - pad
            rows = slice(t * batch, (t + 1) * batch)
            cols = slice(k * c_in, (k + 1) * c_in)
            if 0 <= src < l_in:
                patch_ref[rows, cols] = get_row(src)
            else:
                patch_ref[rows, cols] = zero_blk
    return l_out


def _lrelu(v):
    return jnp.maximum(v, NEG_SLOPE * v)


def _batchnorm(z, g, b):
    # Training-mode batch statistics over all (batch, position) rows.
    # Exact (matches PyTorch) because the whole layer is one un-tiled block.
    mean = jnp.mean(z, axis=0, keepdims=True)
    var = jnp.mean(jnp.square(z - mean), axis=0, keepdims=True)
    return g * ((z - mean) * jax.lax.rsqrt(var + BN_EPS)) + b


def _encoder_kernel(x_ref, w1_ref, w2_ref, w3_ref, w4_ref,
                    g2_ref, b2_ref, g3_ref, b3_ref,
                    o_ref, p1, p2, p3, p4):
    l_in, batch, nc = x_ref.shape

    # Layer 1: Conv1d(nc -> ndf, K=4, s=2, p=1) + LeakyReLU.
    l1 = _build_patches(p1, lambda s: x_ref[s], l_in, nc, 2, 1, batch)
    h1 = _lrelu(jnp.dot(p1[...], w1_ref[...],
                        preferred_element_type=jnp.float32))

    # Layer 2: Conv1d(ndf -> 2ndf, K=4, s=2, p=1) + BN + LeakyReLU.
    c1 = w1_ref.shape[1]
    l2 = _build_patches(p2, lambda s: h1[s * batch:(s + 1) * batch, :],
                        l1, c1, 2, 1, batch)
    z2 = jnp.dot(p2[...], w2_ref[...], preferred_element_type=jnp.float32)
    h2 = _lrelu(_batchnorm(z2, g2_ref[...], b2_ref[...]))

    # Layer 3: Conv1d(2ndf -> 4ndf, K=4, s=2, p=1) + BN + LeakyReLU.
    c2 = w2_ref.shape[1]
    l3 = _build_patches(p3, lambda s: h2[s * batch:(s + 1) * batch, :],
                        l2, c2, 2, 1, batch)
    z3 = jnp.dot(p3[...], w3_ref[...], preferred_element_type=jnp.float32)
    h3 = _lrelu(_batchnorm(z3, g3_ref[...], b3_ref[...]))

    # Layer 4: Conv1d(4ndf -> nz, K=2, s=1, p=0) + AdaptiveAvgPool1d(1).
    # The conv is linear, so pool-over-positions commutes through it:
    #   mean_t( [h3[t] | h3[t+1]] @ W4 ) = [sum_t h3[t] | sum_t h3[t+1]] @ W4 / L4
    # p4: (batch, 2*c3) holds the per-tap position sums.
    c3 = w3_ref.shape[1]
    k4 = w4_ref.shape[0] // c3
    l4 = l3 - k4 + 1                      # stride 1, no padding
    for k in range(k4):
        acc = h3[k * batch:(k + 1) * batch, :]
        for t in range(1, l4):
            acc = acc + h3[(t + k) * batch:(t + k + 1) * batch, :]
        p4[:, k * c3:(k + 1) * c3] = acc
    z4 = jnp.dot(p4[...], w4_ref[...], preferred_element_type=jnp.float32)
    o_ref[...] = z4 * (1.0 / float(l4))


# ------------------------------- JAX wrapper ---------------------------------

def _pack_weight(w):
    """(C_out, C_in, K) torch layout -> (K*C_in, C_out) matmul layout."""
    c_out, c_in, k = w.shape
    return jnp.transpose(w, (2, 1, 0)).reshape(k * c_in, c_out)


def _conv_out_len(l, k, s, p):
    return (l + 2 * p - k) // s + 1


@jax.jit
def encoder_forward(params, x_ncw):
    """x_ncw: (B, nc, L) like PyTorch Conv1d input.  Returns (B, nz, 1)."""
    b, nc, l = x_ncw.shape
    nz = params["w4"].shape[0]

    # Position-major layout so the kernel indexes positions on the leading dim.
    x_lbc = jnp.transpose(x_ncw, (2, 0, 1)).astype(jnp.float32)   # (L, B, nc)

    w1 = _pack_weight(params["w1"].astype(jnp.float32))
    w2 = _pack_weight(params["w2"].astype(jnp.float32))
    w3 = _pack_weight(params["w3"].astype(jnp.float32))
    w4 = _pack_weight(params["w4"].astype(jnp.float32))
    g2 = params["g2"].reshape(1, -1).astype(jnp.float32)
    b2 = params["b2"].reshape(1, -1).astype(jnp.float32)
    g3 = params["g3"].reshape(1, -1).astype(jnp.float32)
    b3 = params["b3"].reshape(1, -1).astype(jnp.float32)

    l1 = _conv_out_len(l, 4, 2, 1)
    l2 = _conv_out_len(l1, 4, 2, 1)
    l3 = _conv_out_len(l2, 4, 2, 1)

    def vmem():
        return pl.BlockSpec(memory_space=pltpu.MemorySpace.VMEM)

    out = pl.pallas_call(
        _encoder_kernel,
        out_shape=jax.ShapeDtypeStruct((b, nz), jnp.float32),
        in_specs=[vmem() for _ in range(9)],
        out_specs=vmem(),
        scratch_shapes=[
            pltpu.VMEM((l1 * b, w1.shape[0]), jnp.float32),   # layer-1 patches
            pltpu.VMEM((l2 * b, w2.shape[0]), jnp.float32),   # layer-2 patches
            pltpu.VMEM((l3 * b, w3.shape[0]), jnp.float32),   # layer-3 patches
            pltpu.VMEM((b, w4.shape[0]), jnp.float32),        # pooled layer-4 taps
        ],
    )(x_lbc, w1, w2, w3, w4, g2, b2, g3, b3)

    return out.reshape(b, nz, 1)


# ------------------------- pure-JAX reference (check) ------------------------

def _reference_forward(params, x_ncw):
    def conv(x, w, stride, pad):
        return jax.lax.conv_general_dilated(
            x, w, window_strides=(stride,), padding=[(pad, pad)],
            dimension_numbers=("NCH", "OIH", "NCH"))

    def bn(x, g, b):
        mean = jnp.mean(x, axis=(0, 2), keepdims=True)
        var = jnp.mean(jnp.square(x - mean), axis=(0, 2), keepdims=True)
        xn = (x - mean) * jax.lax.rsqrt(var + BN_EPS)
        return g.reshape(1, -1, 1) * xn + b.reshape(1, -1, 1)

    def lrelu(v):
        return jnp.maximum(v, NEG_SLOPE * v)

    h = lrelu(conv(x_ncw.astype(jnp.float32), params["w1"], 2, 1))
    h = lrelu(bn(conv(h, params["w2"], 2, 1), params["g2"], params["b2"]))
    h = lrelu(bn(conv(h, params["w3"], 2, 1), params["g3"], params["b3"]))
    h = conv(h, params["w4"], 1, 0)
    return jnp.mean(h, axis=2, keepdims=True)


# ---------------------------------- params -----------------------------------

def init_params(key, nc, ndf, nz):
    ks = jax.random.split(key, 4)
    scale = 0.05
    return {
        "w1": scale * jax.random.normal(ks[0], (ndf, nc, 4), jnp.float32),
        "w2": scale * jax.random.normal(ks[1], (ndf * 2, ndf, 4), jnp.float32),
        "w3": scale * jax.random.normal(ks[2], (ndf * 4, ndf * 2, 4), jnp.float32),
        "w4": scale * jax.random.normal(ks[3], (nz, ndf * 4, 2), jnp.float32),
        # BatchNorm affine params (deterministic, non-trivial).
        "g2": 1.0 + 0.01 * jnp.arange(ndf * 2, dtype=jnp.float32),
        "b2": 0.01 * jnp.arange(ndf * 2, dtype=jnp.float32),
        "g3": 1.0 - 0.005 * jnp.arange(ndf * 4, dtype=jnp.float32),
        "b3": -0.02 * jnp.ones((ndf * 4,), jnp.float32),
    }


# ---------------------------------- driver -----------------------------------

if __name__ == "__main__":
    # opt: nc=4 input channels, ndf=8, nz=32; batch=2, sequence length=16.
    B, NC, NDF, NZ, L = 2, 4, 8, 32, 16

    key = jax.random.PRNGKey(0)
    k_x, k_p = jax.random.split(key)
    x = jax.random.normal(k_x, (B, NC, L), jnp.float32)  # NCW, like PyTorch
    params = init_params(k_p, NC, NDF, NZ)

    out = jax.block_until_ready(encoder_forward(params, x))
    assert out.shape == (B, NZ, 1), out.shape
    assert bool(jnp.all(jnp.isfinite(out)))

    # Structural correctness check against a plain-XLA reference (loose
    # tolerance: MXU matmul precision may differ from XLA's conv path).
    ref = jax.block_until_ready(jax.jit(_reference_forward)(params, x))
    assert jnp.allclose(out, ref, atol=2e-2, rtol=2e-2), (
        float(jnp.max(jnp.abs(out - ref))))

    print("KERNEL_OK")
</pallas_src>

<mosaic_0001>
module attributes {stable_mosaic.version = 11 : i64} {
  func.func @_encoder_kernel(%arg0: memref<16x2x4xf32, #tpu.memory_space<vmem>>, %arg1: memref<16x8xf32, #tpu.memory_space<vmem>>, %arg2: memref<32x16xf32, #tpu.memory_space<vmem>>, %arg3: memref<64x32xf32, #tpu.memory_space<vmem>>, %arg4: memref<64x32xf32, #tpu.memory_space<vmem>>, %arg5: memref<1x16xf32, #tpu.memory_space<vmem>>, %arg6: memref<1x16xf32, #tpu.memory_space<vmem>>, %arg7: memref<1x32xf32, #tpu.memory_space<vmem>>, %arg8: memref<1x32xf32, #tpu.memory_space<vmem>>, %arg9: memref<2x32xf32, #tpu.memory_space<vmem>>, %arg10: memref<16x16xf32, #tpu.memory_space<vmem>>, %arg11: memref<8x32xf32, #tpu.memory_space<vmem>>, %arg12: memref<4x64xf32, #tpu.memory_space<vmem>>, %arg13: memref<2x64xf32, #tpu.memory_space<vmem>>) attributes {dimension_semantics = [], scalar_prefetch = 0 : i64, scratch_operands = 4 : i64, tpu.core_type = #tpu.core_type<tc>} {
    %cst = arith.constant 0.000000e+00 : f32
    %0 = vector.broadcast %cst : f32 to vector<2x4xf32>
    %c0 = arith.constant 0 : index
    %c0_0 = arith.constant 0 : index
    %1 = vector.load %arg10[%c0, %c0_0] : memref<16x16xf32, #tpu.memory_space<vmem>>, vector<2x4xf32>
    tpu.vector_store %arg10[%c0, %c0_0], %0 {strides = array<i32>} : memref<16x16xf32, #tpu.memory_space<vmem>>, vector<2x4xf32>,
    %c0_1 = arith.constant 0 : index
    %c0_2 = arith.constant 0 : index
    %c0_3 = arith.constant 0 : index
    %2 = vector.load %arg0[%c0_1, %c0_2, %c0_3] : memref<16x2x4xf32, #tpu.memory_space<vmem>>, vector<1x2x4xf32>
    %3 = vector.shape_cast %2 : vector<1x2x4xf32> to vector<2x4xf32>
    %c0_4 = arith.constant 0 : index
    %c4 = arith.constant 4 : index
    %4 = vector.load %arg10[%c0_4, %c4] : memref<16x16xf32, #tpu.memory_space<vmem>>, vector<2x4xf32>
    tpu.vector_store %arg10[%c0_4, %c4], %3 {strides = array<i32>} : memref<16x16xf32, #tpu.memory_space<vmem>>, vector<2x4xf32>,
    %c1 = arith.constant 1 : index
    %c0_5 = arith.constant 0 : index
    %c0_6 = arith.constant 0 : index
    %5 = vector.load %arg0[%c1, %c0_5, %c0_6] : memref<16x2x4xf32, #tpu.memory_space<vmem>>, vector<1x2x4xf32>
    %6 = vector.shape_cast %5 : vector<1x2x4xf32> to vector<2x4xf32>
    %c0_7 = arith.constant 0 : index
    %c8 = arith.constant 8 : index
    %7 = vector.load %arg10[%c0_7, %c8] : memref<16x16xf32, #tpu.memory_space<vmem>>, vector<2x4xf32>
    tpu.vector_store %arg10[%c0_7, %c8], %6 {strides = array<i32>} : memref<16x16xf32, #tpu.memory_space<vmem>>, vector<2x4xf32>,
    %c2 = arith.constant 2 : index
    %c0_8 = arith.constant 0 : index
    %c0_9 = arith.constant 0 : index
    %8 = vector.load %arg0[%c2, %c0_8, %c0_9] : memref<16x2x4xf32, #tpu.memory_space<vmem>>, vector<1x2x4xf32>
    %9 = vector.shape_cast %8 : vector<1x2x4xf32> to vector<2x4xf32>
    %c0_10 = arith.constant 0 : index
    %c12 = arith.constant 12 : index
    %10 = vector.load %arg10[%c0_10, %c12] : memref<16x16xf32, #tpu.memory_space<vmem>>, vector<2x4xf32>
    tpu.vector_store %arg10[%c0_10, %c12], %9 {strides = array<i32>} : memref<16x16xf32, #tpu.memory_space<vmem>>, vector<2x4xf32>,
    %c1_11 = arith.constant 1 : index
    %c0_12 = arith.constant 0 : index
    %c0_13 = arith.constant 0 : index
    %11 = vector.load %arg0[%c1_11, %c0_12, %c0_13] : memref<16x2x4xf32, #tpu.memory_space<vmem>>, vector<1x2x4xf32>
    %12 = vector.shape_cast %11 : vector<1x2x4xf32> to vector<2x4xf32>
    %c2_14 = arith.constant 2 : index
    %c0_15 = arith.constant 0 : index
    %13 = vector.load %arg10[%c2_14, %c0_15] : memref<16x16xf32, #tpu.memory_space<vmem>>, vector<2x4xf32>
    tpu.vector_store %arg10[%c2_14, %c0_15], %12 {strides = array<i32>} : memref<16x16xf32, #tpu.memory_space<vmem>>, vector<2x4xf32>,
    %c2_16 = arith.constant 2 : index
    %c0_17 = arith.constant 0 : index
    %c0_18 = arith.constant 0 : index
    %14 = vector.load %arg0[%c2_16, %c0_17, %c0_18] : memref<16x2x4xf32, #tpu.memory_space<vmem>>, vector<1x2x4xf32>
    %15 = vector.shape_cast %14 : vector<1x2x4xf32> to vector<2x4xf32>
    %c2_19 = arith.constant 2 : index
    %c4_20 = arith.constant 4 : index
    %16 = vector.load %arg10[%c2_19, %c4_20] : memref<16x16xf32, #tpu.memory_space<vmem>>, vector<2x4xf32>
    tpu.vector_store %arg10[%c2_19, %c4_20], %15 {strides = array<i32>} : memref<16x16xf32, #tpu.memory_space<vmem>>, vector<2x4xf32>,
    %c3 = arith.constant 3 : index
    %c0_21 = arith.constant 0 : index
    %c0_22 = arith.constant 0 : index
    %17 = vector.load %arg0[%c3, %c0_21, %c0_22] : memref<16x2x4xf32, #tpu.memory_space<vmem>>, vector<1x2x4xf32>
    %18 = vector.shape_cast %17 : vector<1x2x4xf32> to vector<2x4xf32>
    %c2_23 = arith.constant 2 : index
    %c8_24 = arith.constant 8 : index
    %19 = vector.load %arg10[%c2_23, %c8_24] : memref<16x16xf32, #tpu.memory_space<vmem>>, vector<2x4xf32>
    tpu.vector_store %arg10[%c2_23, %c8_24], %18 {strides = array<i32>} : memref<16x16xf32, #tpu.memory_space<vmem>>, vector<2x4xf32>,
    %c4_25 = arith.constant 4 : index
    %c0_26 = arith.constant 0 : index
    %c0_27 = arith.constant 0 : index
    %20 = vector.load %arg0[%c4_25, %c0_26, %c0_27] : memref<16x2x4xf32, #tpu.memory_space<vmem>>, vector<1x2x4xf32>
    %21 = vector.shape_cast %20 : vector<1x2x4xf32> to vector<2x4xf32>
    %c2_28 = arith.constant 2 : index
    %c12_29 = arith.constant 12 : index
    %22 = vector.load %arg10[%c2_28, %c12_29] : memref<16x16xf32, #tpu.memory_space<vmem>>, vector<2x4xf32>
    tpu.vector_store %arg10[%c2_28, %c12_29], %21 {strides = array<i32>} : memref<16x16xf32, #tpu.memory_space<vmem>>, vector<2x4xf32>,
    %c3_30 = arith.constant 3 : index
    %c0_31 = arith.constant 0 : index
    %c0_32 = arith.constant 0 : index
    %23 = vector.load %arg0[%c3_30, %c0_31, %c0_32] : memref<16x2x4xf32, #tpu.memory_space<vmem>>, vector<1x2x4xf32>
    %24 = vector.shape_cast %23 : vector<1x2x4xf32> to vector<2x4xf32>
    %c4_33 = arith.constant 4 : index
    %c0_34 = arith.constant 0 : index
    %25 = vector.load %arg10[%c4_33, %c0_34] : memref<16x16xf32, #tpu.memory_space<vmem>>, vector<2x4xf32>
    tpu.vector_store %arg10[%c4_33, %c0_34], %24 {strides = array<i32>} : memref<16x16xf32, #tpu.memory_space<vmem>>, vector<2x4xf32>,
    %c4_35 = arith.constant 4 : index
    %c0_36 = arith.constant 0 : index
    %c0_37 = arith.constant 0 : index
    %26 = vector.load %arg0[%c4_35, %c0_36, %c0_37] : memref<16x2x4xf32, #tpu.memory_space<vmem>>, vector<1x2x4xf32>
    %27 = vector.shape_cast %26 : vector<1x2x4xf32> to vector<2x4xf32>
    %c4_38 = arith.constant 4 : index
    %c4_39 = arith.constant 4 : index
    %28 = vector.load %arg10[%c4_38, %c4_39] : memref<16x16xf32, #tpu.memory_space<vmem>>, vector<2x4xf32>
    tpu.vector_store %arg10[%c4_38, %c4_39], %27 {strides = array<i32>} : memref<16x16xf32, #tpu.memory_space<vmem>>, vector<2x4xf32>,
    %c5 = arith.constant 5 : index
    %c0_40 = arith.constant 0 : index
    %c0_41 = arith.constant 0 : index
    %29 = vector.load %arg0[%c5, %c0_40, %c0_41] : memref<16x2x4xf32, #tpu.memory_space<vmem>>, vector<1x2x4xf32>
    %30 = vector.shape_cast %29 : vector<1x2x4xf32> to vector<2x4xf32>
    %c4_42 = arith.constant 4 : index
    %c8_43 = arith.constant 8 : index
    %31 = vector.load %arg10[%c4_42, %c8_43] : memref<16x16xf32, #tpu.memory_space<vmem>>, vector<2x4xf32>
    tpu.vector_store %arg10[%c4_42, %c8_43], %30 {strides = array<i32>} : memref<16x16xf32, #tpu.memory_space<vmem>>, vector<2x4xf32>,
    %c6 = arith.constant 6 : index
    %c0_44 = arith.constant 0 : index
    %c0_45 = arith.constant 0 : index
    %32 = vector.load %arg0[%c6, %c0_44, %c0_45] : memref<16x2x4xf32, #tpu.memory_space<vmem>>, vector<1x2x4xf32>
    %33 = vector.shape_cast %32 : vector<1x2x4xf32> to vector<2x4xf32>
    %c4_46 = arith.constant 4 : index
    %c12_47 = arith.constant 12 : index
    %34 = vector.load %arg10[%c4_46, %c12_47] : memref<16x16xf32, #tpu.memory_space<vmem>>, vector<2x4xf32>
    tpu.vector_store %arg10[%c4_46, %c12_47], %33 {strides = array<i32>} : memref<16x16xf32, #tpu.memory_space<vmem>>, vector<2x4xf32>,
    %c5_48 = arith.constant 5 : index
    %c0_49 = arith.constant 0 : index
    %c0_50 = arith.constant 0 : index
    %35 = vector.load %arg0[%c5_48, %c0_49, %c0_50] : memref<16x2x4xf32, #tpu.memory_space<vmem>>, vector<1x2x4xf32>
    %36 = vector.shape_cast %35 : vector<1x2x4xf32> to vector<2x4xf32>
    %c6_51 = arith.constant 6 : index
    %c0_52 = arith.constant 0 : index
    %37 = vector.load %arg10[%c6_51, %c0_52] : memref<16x16xf32, #tpu.memory_space<vmem>>, vector<2x4xf32>
    tpu.vector_store %arg10[%c6_51, %c0_52], %36 {strides = array<i32>} : memref<16x16xf32, #tpu.memory_space<vmem>>, vector<2x4xf32>,
    %c6_53 = arith.constant 6 : index
    %c0_54 = arith.constant 0 : index
    %c0_55 = arith.constant 0 : index
    %38 = vector.load %arg0[%c6_53, %c0_54, %c0_55] : memref<16x2x4xf32, #tpu.memory_space<vmem>>, vector<1x2x4xf32>
    %39 = vector.shape_cast %38 : vector<1x2x4xf32> to vector<2x4xf32>
    %c6_56 = arith.constant 6 : index
    %c4_57 = arith.constant 4 : index
    %40 = vector.load %arg10[%c6_56, %c4_57] : memref<16x16xf32, #tpu.memory_space<vmem>>, vector<2x4xf32>
    tpu.vector_store %arg10[%c6_56, %c4_57], %39 {strides = array<i32>} : memref<16x16xf32, #tpu.memory_space<vmem>>, vector<2x4xf32>,
    %c7 = arith.constant 7 : index
    %c0_58 = arith.constant 0 : index
    %c0_59 = arith.constant 0 : index
    %41 = vector.load %arg0[%c7, %c0_58, %c0_59] : memref<16x2x4xf32, #tpu.memory_space<vmem>>, vector<1x2x4xf32>
    %42 = vector.shape_cast %41 : vector<1x2x4xf32> to vector<2x4xf32>
    %c6_60 = arith.constant 6 : index
    %c8_61 = arith.constant 8 : index
    %43 = vector.load %arg10[%c6_60, %c8_61] : memref<16x16xf32, #tpu.memory_space<vmem>>, vector<2x4xf32>
    tpu.vector_store %arg10[%c6_60, %c8_61], %42 {strides = array<i32>} : memref<16x16xf32, #tpu.memory_space<vmem>>, vector<2x4xf32>,
    %c8_62 = arith.constant 8 : index
    %c0_63 = arith.constant 0 : index
    %c0_64 = arith.constant 0 : index
    %44 = vector.load %arg0[%c8_62, %c0_63, %c0_64] : memref<16x2x4xf32, #tpu.memory_space<vmem>>, vector<1x2x4xf32>
    %45 = vector.shape_cast %44 : vector<1x2x4xf32> to vector<2x4xf32>
    %c6_65 = arith.constant 6 : index
    %c12_66 = arith.constant 12 : index
    %46 = vector.load %arg10[%c6_65, %c12_66] : memref<16x16xf32, #tpu.memory_space<vmem>>, vector<2x4xf32>
    tpu.vector_store %arg10[%c6_65, %c12_66], %45 {strides = array<i32>} : memref<16x16xf32, #tpu.memory_space<vmem>>, vector<2x4xf32>,
    %c7_67 = arith.constant 7 : index
    %c0_68 = arith.constant 0 : index
    %c0_69 = arith.constant 0 : index
    %47 = vector.load %arg0[%c7_67, %c0_68, %c0_69] : memref<16x2x4xf32, #tpu.memory_space<vmem>>, vector<1x2x4xf32>
    %48 = vector.shape_cast %47 : vector<1x2x4xf32> to vector<2x4xf32>
    %c8_70 = arith.constant 8 : index
    %c0_71 = arith.constant 0 : index
    %49 = vector.load %arg10[%c8_70, %c0_71] : memref<16x16xf32, #tpu.memory_space<vmem>>, vector<2x4xf32>
    tpu.vector_store %arg10[%c8_70, %c0_71], %48 {strides = array<i32>} : memref<16x16xf32, #tpu.memory_space<vmem>>, vector<2x4xf32>,
    %c8_72 = arith.constant 8 : index
    %c0_73 = arith.constant 0 : index
    %c0_74 = arith.constant 0 : index
    %50 = vector.load %arg0[%c8_72, %c0_73, %c0_74] : memref<16x2x4xf32, #tpu.memory_space<vmem>>, vector<1x2x4xf32>
    %51 = vector.shape_cast %50 : vector<1x2x4xf32> to vector<2x4xf32>
    %c8_75 = arith.constant 8 : index
    %c4_76 = arith.constant 4 : index
    %52 = vector.load %arg10[%c8_75, %c4_76] : memref<16x16xf32, #tpu.memory_space<vmem>>, vector<2x4xf32>
    tpu.vector_store %arg10[%c8_75, %c4_76], %51 {strides = array<i32>} : memref<16x16xf32, #tpu.memory_space<vmem>>, vector<2x4xf32>,
    %c9 = arith.constant 9 : index
    %c0_77 = arith.constant 0 : index
    %c0_78 = arith.constant 0 : index
    %53 = vector.load %arg0[%c9, %c0_77, %c0_78] : memref<16x2x4xf32, #tpu.memory_space<vmem>>, vector<1x2x4xf32>
    %54 = vector.shape_cast %53 : vector<1x2x4xf32> to vector<2x4xf32>
    %c8_79 = arith.constant 8 : index
    %c8_80 = arith.constant 8 : index
    %55 = vector.load %arg10[%c8_79, %c8_80] : memref<16x16xf32, #tpu.memory_space<vmem>>, vector<2x4xf32>
    tpu.vector_store %arg10[%c8_79, %c8_80], %54 {strides = array<i32>} : memref<16x16xf32, #tpu.memory_space<vmem>>, vector<2x4xf32>,
    %c10 = arith.constant 10 : index
    %c0_81 = arith.constant 0 : index
    %c0_82 = arith.constant 0 : index
    %56 = vector.load %arg0[%c10, %c0_81, %c0_82] : memref<16x2x4xf32, #tpu.memory_space<vmem>>, vector<1x2x4xf32>
    %57 = vector.shape_cast %56 : vector<1x2x4xf32> to vector<2x4xf32>
    %c8_83 = arith.constant 8 : index
    %c12_84 = arith.constant 12 : index
    %58 = vector.load %arg10[%c8_83, %c12_84] : memref<16x16xf32, #tpu.memory_space<vmem>>, vector<2x4xf32>
    tpu.vector_store %arg10[%c8_83, %c12_84], %57 {strides = array<i32>} : memref<16x16xf32, #tpu.memory_space<vmem>>, vector<2x4xf32>,
    %c9_85 = arith.constant 9 : index
    %c0_86 = arith.constant 0 : index
    %c0_87 = arith.constant 0 : index
    %59 = vector.load %arg0[%c9_85, %c0_86, %c0_87] : memref<16x2x4xf32, #tpu.memory_space<vmem>>, vector<1x2x4xf32>
    %60 = vector.shape_cast %59 : vector<1x2x4xf32> to vector<2x4xf32>
    %c10_88 = arith.constant 10 : index
    %c0_89 = arith.constant 0 : index
    %61 = vector.load %arg10[%c10_88, %c0_89] : memref<16x16xf32, #tpu.memory_space<vmem>>, vector<2x4xf32>
    tpu.vector_store %arg10[%c10_88, %c0_89], %60 {strides = array<i32>} : memref<16x16xf32, #tpu.memory_space<vmem>>, vector<2x4xf32>,
    %c10_90 = arith.constant 10 : index
    %c0_91 = arith.constant 0 : index
    %c0_92 = arith.constant 0 : index
    %62 = vector.load %arg0[%c10_90, %c0_91, %c0_92] : memref<16x2x4xf32, #tpu.memory_space<vmem>>, vector<1x2x4xf32>
    %63 = vector.shape_cast %62 : vector<1x2x4xf32> to vector<2x4xf32>
    %c10_93 = arith.constant 10 : index
    %c4_94 = arith.constant 4 : index
    %64 = vector.load %arg10[%c10_93, %c4_94] : memref<16x16xf32, #tpu.memory_space<vmem>>, vector<2x4xf32>
    tpu.vector_store %arg10[%c10_93, %c4_94], %63 {strides = array<i32>} : memref<16x16xf32, #tpu.memory_space<vmem>>, vector<2x4xf32>,
    %c11 = arith.constant 11 : index
    %c0_95 = arith.constant 0 : index
    %c0_96 = arith.constant 0 : index
    %65 = vector.load %arg0[%c11, %c0_95, %c0_96] : memref<16x2x4xf32, #tpu.memory_space<vmem>>, vector<1x2x4xf32>
    %66 = vector.shape_cast %65 : vector<1x2x4xf32> to vector<2x4xf32>
    %c10_97 = arith.constant 10 : index
    %c8_98 = arith.constant 8 : index
    %67 = vector.load %arg10[%c10_97, %c8_98] : memref<16x16xf32, #tpu.memory_space<vmem>>, vector<2x4xf32>
    tpu.vector_store %arg10[%c10_97, %c8_98], %66 {strides = array<i32>} : memref<16x16xf32, #tpu.memory_space<vmem>>, vector<2x4xf32>,
    %c12_99 = arith.constant 12 : index
    %c0_100 = arith.constant 0 : index
    %c0_101 = arith.constant 0 : index
    %68 = vector.load %arg0[%c12_99, %c0_100, %c0_101] : memref<16x2x4xf32, #tpu.memory_space<vmem>>, vector<1x2x4xf32>
    %69 = vector.shape_cast %68 : vector<1x2x4xf32> to vector<2x4xf32>
    %c10_102 = arith.constant 10 : index
    %c12_103 = arith.constant 12 : index
    %70 = vector.load %arg10[%c10_102, %c12_103] : memref<16x16xf32, #tpu.memory_space<vmem>>, vector<2x4xf32>
    tpu.vector_store %arg10[%c10_102, %c12_103], %69 {strides = array<i32>} : memref<16x16xf32, #tpu.memory_space<vmem>>, vector<2x4xf32>,
    %c11_104 = arith.constant 11 : index
    %c0_105 = arith.constant 0 : index
    %c0_106 = arith.constant 0 : index
    %71 = vector.load %arg0[%c11_104, %c0_105, %c0_106] : memref<16x2x4xf32, #tpu.memory_space<vmem>>, vector<1x2x4xf32>
    %72 = vector.shape_cast %71 : vector<1x2x4xf32> to vector<2x4xf32>
    %c12_107 = arith.constant 12 : index
    %c0_108 = arith.constant 0 : index
    %73 = vector.load %arg10[%c12_107, %c0_108] : memref<16x16xf32, #tpu.memory_space<vmem>>, vector<2x4xf32>
    tpu.vector_store %arg10[%c12_107, %c0_108], %72 {strides = array<i32>} : memref<16x16xf32, #tpu.memory_space<vmem>>, vector<2x4xf32>,
    %c12_109 = arith.constant 12 : index
    %c0_110 = arith.constant 0 : index
    %c0_111 = arith.constant 0 : index
    %74 = vector.load %arg0[%c12_109, %c0_110, %c0_111] : memref<16x2x4xf32, #tpu.memory_space<vmem>>, vector<1x2x4xf32>
    %75 = vector.shape_cast %74 : vector<1x2x4xf32> to vector<2x4xf32>
    %c12_112 = arith.constant 12 : index
    %c4_113 = arith.constant 4 : index
    %76 = vector.load %arg10[%c12_112, %c4_113] : memref<16x16xf32, #tpu.memory_space<vmem>>, vector<2x4xf32>
    tpu.vector_store %arg10[%c12_112, %c4_113], %75 {strides = array<i32>} : memref<16x16xf32, #tpu.memory_space<vmem>>, vector<2x4xf32>,
    %c13 = arith.constant 13 : index
    %c0_114 = arith.constant 0 : index
    %c0_115 = arith.constant 0 : index
    %77 = vector.load %arg0[%c13, %c0_114, %c0_115] : memref<16x2x4xf32, #tpu.memory_space<vmem>>, vector<1x2x4xf32>
    %78 = vector.shape_cast %77 : vector<1x2x4xf32> to vector<2x4xf32>
    %c12_116 = arith.constant 12 : index
    %c8_117 = arith.constant 8 : index
    %79 = vector.load %arg10[%c12_116, %c8_117] : memref<16x16xf32, #tpu.memory_space<vmem>>, vector<2x4xf32>
    tpu.vector_store %arg10[%c12_116, %c8_117], %78 {strides = array<i32>} : memref<16x16xf32, #tpu.memory_space<vmem>>, vector<2x4xf32>,
    %c14 = arith.constant 14 : index
    %c0_118 = arith.constant 0 : index
    %c0_119 = arith.constant 0 : index
    %80 = vector.load %arg0[%c14, %c0_118, %c0_119] : memref<16x2x4xf32, #tpu.memory_space<vmem>>, vector<1x2x4xf32>
    %81 = vector.shape_cast %80 : vector<1x2x4xf32> to vector<2x4xf32>
    %c12_120 = arith.constant 12 : index
    %c12_121 = arith.constant 12 : index
    %82 = vector.load %arg10[%c12_120, %c12_121] : memref<16x16xf32, #tpu.memory_space<vmem>>, vector<2x4xf32>
    tpu.vector_store %arg10[%c12_120, %c12_121], %81 {strides = array<i32>} : memref<16x16xf32, #tpu.memory_space<vmem>>, vector<2x4xf32>,
    %c13_122 = arith.constant 13 : index
    %c0_123 = arith.constant 0 : index
    %c0_124 = arith.constant 0 : index
    %83 = vector.load %arg0[%c13_122, %c0_123, %c0_124] : memref<16x2x4xf32, #tpu.memory_space<vmem>>, vector<1x2x4xf32>
    %84 = vector.shape_cast %83 : vector<1x2x4xf32> to vector<2x4xf32>
    %c14_125 = arith.constant 14 : index
    %c0_126 = arith.constant 0 : index
    %85 = vector.load %arg10[%c14_125, %c0_126] : memref<16x16xf32, #tpu.memory_space<vmem>>, vector<2x4xf32>
    tpu.vector_store %arg10[%c14_125, %c0_126], %84 {strides = array<i32>} : memref<16x16xf32, #tpu.memory_space<vmem>>, vector<2x4xf32>,
    %c14_127 = arith.constant 14 : index
    %c0_128 = arith.constant 0 : index
    %c0_129 = arith.constant 0 : index
    %86 = vector.load %arg0[%c14_127, %c0_128, %c0_129] : memref<16x2x4xf32, #tpu.memory_space<vmem>>, vector<1x2x4xf32>
    %87 = vector.shape_cast %86 : vector<1x2x4xf32> to vector<2x4xf32>
    %c14_130 = arith.constant 14 : index
    %c4_131 = arith.constant 4 : index
    %88 = vector.load %arg10[%c14_130, %c4_131] : memref<16x16xf32, #tpu.memory_space<vmem>>, vector<2x4xf32>
    tpu.vector_store %arg10[%c14_130, %c4_131], %87 {strides = array<i32>} : memref<16x16xf32, #tpu.memory_space<vmem>>, vector<2x4xf32>,
    %c15 = arith.constant 15 : index
    %c0_132 = arith.constant 0 : index
    %c0_133 = arith.constant 0 : index
    %89 = vector.load %arg0[%c15, %c0_132, %c0_133] : memref<16x2x4xf32, #tpu.memory_space<vmem>>, vector<1x2x4xf32>
    %90 = vector.shape_cast %89 : vector<1x2x4xf32> to vector<2x4xf32>
    %c14_134 = arith.constant 14 : index
    %c8_135 = arith.constant 8 : index
    %91 = vector.load %arg10[%c14_134, %c8_135] : memref<16x16xf32, #tpu.memory_space<vmem>>, vector<2x4xf32>
    tpu.vector_store %arg10[%c14_134, %c8_135], %90 {strides = array<i32>} : memref<16x16xf32, #tpu.memory_space<vmem>>, vector<2x4xf32>,
    %c14_136 = arith.constant 14 : index
    %c12_137 = arith.constant 12 : index
    %92 = vector.load %arg10[%c14_136, %c12_137] : memref<16x16xf32, #tpu.memory_space<vmem>>, vector<2x4xf32>
    tpu.vector_store %arg10[%c14_136, %c12_137], %0 {strides = array<i32>} : memref<16x16xf32, #tpu.memory_space<vmem>>, vector<2x4xf32>,
    %c0_138 = arith.constant 0 : index
    %c0_139 = arith.constant 0 : index
    %93 = vector.load %arg10[%c0_138, %c0_139] : memref<16x16xf32, #tpu.memory_space<vmem>>, vector<16x16xf32>
    %c0_140 = arith.constant 0 : index
    %c0_141 = arith.constant 0 : index
    %94 = vector.load %arg1[%c0_140, %c0_141] : memref<16x8xf32, #tpu.memory_space<vmem>>, vector<16x8xf32>
    %cst_142 = arith.constant dense<0.000000e+00> : vector<16x8xf32>
    %95 = tpu.matmul %93, %94, %cst_142 {dimension_numbers = #tpu.dot_dimension_numbers<[1], [0], [0], [1], [0, 0, 1, 1], [], []>} : vector<16x16xf32>, vector<16x8xf32>, vector<16x8xf32> -> vector<16x8xf32>
    %cst_143 = arith.constant 2.000000e-01 : f32
    %96 = vector.broadcast %cst_143 : f32 to vector<16x8xf32>
    %97 = arith.mulf %96, %95 : vector<16x8xf32>
    %98 = arith.maximumf %95, %97 : vector<16x8xf32>
    %cst_144 = arith.constant 0.000000e+00 : f32
    %99 = vector.broadcast %cst_144 : f32 to vector<2x8xf32>
    %c0_145 = arith.constant 0 : index
    %c0_146 = arith.constant 0 : index
    %100 = vector.load %arg11[%c0_145, %c0_146] : memref<8x32xf32, #tpu.memory_space<vmem>>, vector<2x8xf32>
    tpu.vector_store %arg11[%c0_145, %c0_146], %99 {strides = array<i32>} : memref<8x32xf32, #tpu.memory_space<vmem>>, vector<2x8xf32>,
    %101 = vector.extract_strided_slice %98 {offsets = [0, 0], sizes = [2, 8], strides = [1, 1]} : vector<16x8xf32> to vector<2x8xf32>
    %c0_147 = arith.constant 0 : index
    %c8_148 = arith.constant 8 : index
    %102 = vector.load %arg11[%c0_147, %c8_148] : memref<8x32xf32, #tpu.memory_space<vmem>>, vector<2x8xf32>
    tpu.vector_store %arg11[%c0_147, %c8_148], %101 {strides = array<i32>} : memref<8x32xf32, #tpu.memory_space<vmem>>, vector<2x8xf32>,
    %103 = vector.extract_strided_slice %98 {offsets = [2, 0], sizes = [2, 8], strides = [1, 1]} : vector<16x8xf32> to vector<2x8xf32>
    %c0_149 = arith.constant 0 : index
    %c16 = arith.constant 16 : index
    %104 = vector.load %arg11[%c0_149, %c16] : memref<8x32xf32, #tpu.memory_space<vmem>>, vector<2x8xf32>
    tpu.vector_store %arg11[%c0_149, %c16], %103 {strides = array<i32>} : memref<8x32xf32, #tpu.memory_space<vmem>>, vector<2x8xf32>,
    %105 = vector.extract_strided_slice %98 {offsets = [4, 0], sizes = [2, 8], strides = [1, 1]} : vector<16x8xf32> to vector<2x8xf32>
    %c0_150 = arith.constant 0 : index
    %c24 = arith.constant 24 : index
    %106 = vector.load %arg11[%c0_150, %c24] : memref<8x32xf32, #tpu.memory_space<vmem>>, vector<2x8xf32>
    tpu.vector_store %arg11[%c0_150, %c24], %105 {strides = array<i32>} : memref<8x32xf32, #tpu.memory_space<vmem>>, vector<2x8xf32>,
    %107 = vector.extract_strided_slice %98 {offsets = [2, 0], sizes = [2, 8], strides = [1, 1]} : vector<16x8xf32> to vector<2x8xf32>
    %c2_151 = arith.constant 2 : index
    %c0_152 = arith.constant 0 : index
    %108 = vector.load %arg11[%c2_151, %c0_152] : memref<8x32xf32, #tpu.memory_space<vmem>>, vector<2x8xf32>
    tpu.vector_store %arg11[%c2_151, %c0_152], %107 {strides = array<i32>} : memref<8x32xf32, #tpu.memory_space<vmem>>, vector<2x8xf32>,
    %109 = vector.extract_strided_slice %98 {offsets = [4, 0], sizes = [2, 8], strides = [1, 1]} : vector<16x8xf32> to vector<2x8xf32>
    %c2_153 = arith.constant 2 : index
    %c8_154 = arith.constant 8 : index
    %110 = vector.load %arg11[%c2_153, %c8_154] : memref<8x32xf32, #tpu.memory_space<vmem>>, vector<2x8xf32>
    tpu.vector_store %arg11[%c2_153, %c8_154], %109 {strides = array<i32>} : memref<8x32xf32, #tpu.memory_space<vmem>>, vector<2x8xf32>,
    %111 = vector.extract_strided_slice %98 {offsets = [6, 0], sizes = [2, 8], strides = [1, 1]} : vector<16x8xf32> to vector<2x8xf32>
    %c2_155 = arith.constant 2 : index
    %c16_156 = arith.constant 16 : index
    %112 = vector.load %arg11[%c2_155, %c16_156] : memref<8x32xf32, #tpu.memory_space<vmem>>, vector<2x8xf32>
    tpu.vector_store %arg11[%c2_155, %c16_156], %111 {strides = array<i32>} : memref<8x32xf32, #tpu.memory_space<vmem>>, vector<2x8xf32>,
    %113 = vector.extract_strided_slice %98 {offsets = [8, 0], sizes = [2, 8], strides = [1, 1]} : vector<16x8xf32> to vector<2x8xf32>
    %c2_157 = arith.constant 2 : index
    %c24_158 = arith.constant 24 : index
    %114 = vector.load %arg11[%c2_157, %c24_158] : memref<8x32xf32, #tpu.memory_space<vmem>>, vector<2x8xf32>
    tpu.vector_store %arg11[%c2_157, %c24_158], %113 {strides = array<i32>} : memref<8x32xf32, #tpu.memory_space<vmem>>, vector<2x8xf32>,
    %115 = vector.extract_strided_slice %98 {offsets = [6, 0], sizes = [2, 8], strides = [1, 1]} : vector<16x8xf32> to vector<2x8xf32>
    %c4_159 = arith.constant 4 : index
    %c0_160 = arith.constant 0 : index
    %116 = vector.load %arg11[%c4_159, %c0_160] : memref<8x32xf32, #tpu.memory_space<vmem>>, vector<2x8xf32>
    tpu.vector_store %arg11[%c4_159, %c0_160], %115 {strides = array<i32>} : memref<8x32xf32, #tpu.memory_space<vmem>>, vector<2x8xf32>,
    %117 = vector.extract_strided_slice %98 {offsets = [8, 0], sizes = [2, 8], strides = [1, 1]} : vector<16x8xf32> to vector<2x8xf32>
    %c4_161 = arith.constant 4 : index
    %c8_162 = arith.constant 8 : index
    %118 = vector.load %arg11[%c4_161, %c8_162] : memref<8x32xf32, #tpu.memory_space<vmem>>, vector<2x8xf32>
    tpu.vector_store %arg11[%c4_161, %c8_162], %117 {strides = array<i32>} : memref<8x32xf32, #tpu.memory_space<vmem>>, vector<2x8xf32>,
    %119 = vector.extract_strided_slice %98 {offsets = [10, 0], sizes = [2, 8], strides = [1, 1]} : vector<16x8xf32> to vector<2x8xf32>
    %c4_163 = arith.constant 4 : index
    %c16_164 = arith.constant 16 : index
    %120 = vector.load %arg11[%c4_163, %c16_164] : memref<8x32xf32, #tpu.memory_space<vmem>>, vector<2x8xf32>
    tpu.vector_store %arg11[%c4_163, %c16_164], %119 {strides = array<i32>} : memref<8x32xf32, #tpu.memory_space<vmem>>, vector<2x8xf32>,
    %121 = vector.extract_strided_slice %98 {offsets = [12, 0], sizes = [2, 8], strides = [1, 1]} : vector<16x8xf32> to vector<2x8xf32>
    %c4_165 = arith.constant 4 : index
    %c24_166 = arith.constant 24 : index
    %122 = vector.load %arg11[%c4_165, %c24_166] : memref<8x32xf32, #tpu.memory_space<vmem>>, vector<2x8xf32>
    tpu.vector_store %arg11[%c4_165, %c24_166], %121 {strides = array<i32>} : memref<8x32xf32, #tpu.memory_space<vmem>>, vector<2x8xf32>,
    %123 = vector.extract_strided_slice %98 {offsets = [10, 0], sizes = [2, 8], strides = [1, 1]} : vector<16x8xf32> to vector<2x8xf32>
    %c6_167 = arith.constant 6 : index
    %c0_168 = arith.constant 0 : index
    %124 = vector.load %arg11[%c6_167, %c0_168] : memref<8x32xf32, #tpu.memory_space<vmem>>, vector<2x8xf32>
    tpu.vector_store %arg11[%c6_167, %c0_168], %123 {strides = array<i32>} : memref<8x32xf32, #tpu.memory_space<vmem>>, vector<2x8xf32>,
    %125 = vector.extract_strided_slice %98 {offsets = [12, 0], sizes = [2, 8], strides = [1, 1]} : vector<16x8xf32> to vector<2x8xf32>
    %c6_169 = arith.constant 6 : index
    %c8_170 = arith.constant 8 : index
    %126 = vector.load %arg11[%c6_169, %c8_170] : memref<8x32xf32, #tpu.memory_space<vmem>>, vector<2x8xf32>
    tpu.vector_store %arg11[%c6_169, %c8_170], %125 {strides = array<i32>} : memref<8x32xf32, #tpu.memory_space<vmem>>, vector<2x8xf32>,
    %127 = vector.extract_strided_slice %98 {offsets = [14, 0], sizes = [2, 8], strides = [1, 1]} : vector<16x8xf32> to vector<2x8xf32>
    %c6_171 = arith.constant 6 : index
    %c16_172 = arith.constant 16 : index
    %128 = vector.load %arg11[%c6_171, %c16_172] : memref<8x32xf32, #tpu.memory_space<vmem>>, vector<2x8xf32>
    tpu.vector_store %arg11[%c6_171, %c16_172], %127 {strides = array<i32>} : memref<8x32xf32, #tpu.memory_space<vmem>>, vector<2x8xf32>,
    %c6_173 = arith.constant 6 : index
    %c24_174 = arith.constant 24 : index
    %129 = vector.load %arg11[%c6_173, %c24_174] : memref<8x32xf32, #tpu.memory_space<vmem>>, vector<2x8xf32>
    tpu.vector_store %arg11[%c6_173, %c24_174], %99 {strides = array<i32>} : memref<8x32xf32, #tpu.memory_space<vmem>>, vector<2x8xf32>,
    %c0_175 = arith.constant 0 : index
    %c0_176 = arith.constant 0 : index
    %130 = vector.load %arg11[%c0_175, %c0_176] : memref<8x32xf32, #tpu.memory_space<vmem>>, vector<8x32xf32>
    %c0_177 = arith.constant 0 : index
    %c0_178 = arith.constant 0 : index
    %131 = vector.load %arg2[%c0_177, %c0_178] : memref<32x16xf32, #tpu.memory_space<vmem>>, vector<32x16xf32>
    %cst_179 = arith.constant dense<0.000000e+00> : vector<8x16xf32>
    %132 = tpu.matmul %130, %131, %cst_179 {dimension_numbers = #tpu.dot_dimension_numbers<[1], [0], [0], [1], [0, 0, 1, 1], [], []>} : vector<8x32xf32>, vector<32x16xf32>, vector<8x16xf32> -> vector<8x16xf32>
    %c0_180 = arith.constant 0 : index
    %c0_181 = arith.constant 0 : index
    %133 = vector.load %arg5[%c0_180, %c0_181] : memref<1x16xf32, #tpu.memory_space<vmem>>, vector<1x16xf32>
    %c0_182 = arith.constant 0 : index
    %c0_183 = arith.constant 0 : index
    %134 = vector.load %arg6[%c0_182, %c0_183] : memref<1x16xf32, #tpu.memory_space<vmem>>, vector<1x16xf32>
    %cst_184 = arith.constant dense<0.000000e+00> : vector<16xf32>
    %135 = vector.multi_reduction <add>, %132, %cst_184 [0] : vector<8x16xf32> to vector<16xf32>
    %136 = vector.shape_cast %135 : vector<16xf32> to vector<1x16xf32>
    %cst_185 = arith.constant 8.000000e+00 : f32
    %137 = vector.broadcast %cst_185 : f32 to vector<1x16xf32>
    %138 = arith.divf %136, %137 : vector<1x16xf32>
    %139 = vector.broadcast %138 : vector<1x16xf32> to vector<8x16xf32>
    %140 = arith.subf %132, %139 : vector<8x16xf32>
    %141 = arith.mulf %140, %140 : vector<8x16xf32>
    %cst_186 = arith.constant dense<0.000000e+00> : vector<16xf32>
    %142 = vector.multi_reduction <add>, %141, %cst_186 [0] : vector<8x16xf32> to vector<16xf32>
    %143 = vector.shape_cast %142 : vector<16xf32> to vector<1x16xf32>
    %cst_187 = arith.constant 8.000000e+00 : f32
    %144 = vector.broadcast %cst_187 : f32 to vector<1x16xf32>
    %145 = arith.divf %143, %144 : vector<1x16xf32>
    %146 = vector.broadcast %138 : vector<1x16xf32> to vector<8x16xf32>
    %147 = arith.subf %132, %146 : vector<8x16xf32>
    %cst_188 = arith.constant 9.99999974E-6 : f32
    %148 = vector.broadcast %cst_188 : f32 to vector<1x16xf32>
    %149 = arith.addf %145, %148 : vector<1x16xf32>
    %150 = math.rsqrt %149 : vector<1x16xf32>
    %151 = vector.broadcast %150 : vector<1x16xf32> to vector<8x16xf32>
    %152 = arith.mulf %147, %151 : vector<8x16xf32>
    %153 = vector.broadcast %133 : vector<1x16xf32> to vector<8x16xf32>
    %154 = arith.mulf %153, %152 : vector<8x16xf32>
    %155 = vector.broadcast %134 : vector<1x16xf32> to vector<8x16xf32>
    %156 = arith.addf %154, %155 : vector<8x16xf32>
    %cst_189 = arith.constant 2.000000e-01 : f32
    %157 = vector.broadcast %cst_189 : f32 to vector<8x16xf32>
    %158 = arith.mulf %157, %156 : vector<8x16xf32>
    %159 = arith.maximumf %156, %158 : vector<8x16xf32>
    %cst_190 = arith.constant 0.000000e+00 : f32
    %160 = vector.broadcast %cst_190 : f32 to vector<2x16xf32>
    %c0_191 = arith.constant 0 : index
    %c0_192 = arith.constant 0 : index
    %161 = vector.load %arg12[%c0_191, %c0_192] : memref<4x64xf32, #tpu.memory_space<vmem>>, vector<2x16xf32>
    tpu.vector_store %arg12[%c0_191, %c0_192], %160 {strides = array<i32>} : memref<4x64xf32, #tpu.memory_space<vmem>>, vector<2x16xf32>,
    %162 = vector.extract_strided_slice %159 {offsets = [0, 0], sizes = [2, 16], strides = [1, 1]} : vector<8x16xf32> to vector<2x16xf32>
    %c0_193 = arith.constant 0 : index
    %c16_194 = arith.constant 16 : index
    %163 = vector.load %arg12[%c0_193, %c16_194] : memref<4x64xf32, #tpu.memory_space<vmem>>, vector<2x16xf32>
    tpu.vector_store %arg12[%c0_193, %c16_194], %162 {strides = array<i32>} : memref<4x64xf32, #tpu.memory_space<vmem>>, vector<2x16xf32>,
    %164 = vector.extract_strided_slice %159 {offsets = [2, 0], sizes = [2, 16], strides = [1, 1]} : vector<8x16xf32> to vector<2x16xf32>
    %c0_195 = arith.constant 0 : index
    %c32 = arith.constant 32 : index
    %165 = vector.load %arg12[%c0_195, %c32] : memref<4x64xf32, #tpu.memory_space<vmem>>, vector<2x16xf32>
    tpu.vector_store %arg12[%c0_195, %c32], %164 {strides = array<i32>} : memref<4x64xf32, #tpu.memory_space<vmem>>, vector<2x16xf32>,
    %166 = vector.extract_strided_slice %159 {offsets = [4, 0], sizes = [2, 16], strides = [1, 1]} : vector<8x16xf32> to vector<2x16xf32>
    %c0_196 = arith.constant 0 : index
    %c48 = arith.constant 48 : index
    %167 = vector.load %arg12[%c0_196, %c48] : memref<4x64xf32, #tpu.memory_space<vmem>>, vector<2x16xf32>
    tpu.vector_store %arg12[%c0_196, %c48], %166 {strides = array<i32>} : memref<4x64xf32, #tpu.memory_space<vmem>>, vector<2x16xf32>,
    %168 = vector.extract_strided_slice %159 {offsets = [2, 0], sizes = [2, 16], strides = [1, 1]} : vector<8x16xf32> to vector<2x16xf32>
    %c2_197 = arith.constant 2 : index
    %c0_198 = arith.constant 0 : index
    %169 = vector.load %arg12[%c2_197, %c0_198] : memref<4x64xf32, #tpu.memory_space<vmem>>, vector<2x16xf32>
    tpu.vector_store %arg12[%c2_197, %c0_198], %168 {strides = array<i32>} : memref<4x64xf32, #tpu.memory_space<vmem>>, vector<2x16xf32>,
    %170 = vector.extract_strided_slice %159 {offsets = [4, 0], sizes = [2, 16], strides = [1, 1]} : vector<8x16xf32> to vector<2x16xf32>
    %c2_199 = arith.constant 2 : index
    %c16_200 = arith.constant 16 : index
    %171 = vector.load %arg12[%c2_199, %c16_200] : memref<4x64xf32, #tpu.memory_space<vmem>>, vector<2x16xf32>
    tpu.vector_store %arg12[%c2_199, %c16_200], %170 {strides = array<i32>} : memref<4x64xf32, #tpu.memory_space<vmem>>, vector<2x16xf32>,
    %172 = vector.extract_strided_slice %159 {offsets = [6, 0], sizes = [2, 16], strides = [1, 1]} : vector<8x16xf32> to vector<2x16xf32>
    %c2_201 = arith.constant 2 : index
    %c32_202 = arith.constant 32 : index
    %173 = vector.load %arg12[%c2_201, %c32_202] : memref<4x64xf32, #tpu.memory_space<vmem>>, vector<2x16xf32>
    tpu.vector_store %arg12[%c2_201, %c32_202], %172 {strides = array<i32>} : memref<4x64xf32, #tpu.memory_space<vmem>>, vector<2x16xf32>,
    %c2_203 = arith.constant 2 : index
    %c48_204 = arith.constant 48 : index
    %174 = vector.load %arg12[%c2_203, %c48_204] : memref<4x64xf32, #tpu.memory_space<vmem>>, vector<2x16xf32>
    tpu.vector_store %arg12[%c2_203, %c48_204], %160 {strides = array<i32>} : memref<4x64xf32, #tpu.memory_space<vmem>>, vector<2x16xf32>,
    %c0_205 = arith.constant 0 : index
    %c0_206 = arith.constant 0 : index
    %175 = vector.load %arg12[%c0_205, %c0_206] : memref<4x64xf32, #tpu.memory_space<vmem>>, vector<4x64xf32>
    %c0_207 = arith.constant 0 : index
    %c0_208 = arith.constant 0 : index
    %176 = vector.load %arg3[%c0_207, %c0_208] : memref<64x32xf32, #tpu.memory_space<vmem>>, vector<64x32xf32>
    %cst_209 = arith.constant dense<0.000000e+00> : vector<4x32xf32>
    %177 = tpu.matmul %175, %176, %cst_209 {dimension_numbers = #tpu.dot_dimension_numbers<[1], [0], [0], [1], [0, 0, 1, 1], [], []>} : vector<4x64xf32>, vector<64x32xf32>, vector<4x32xf32> -> vector<4x32xf32>
    %c0_210 = arith.constant 0 : index
    %c0_211 = arith.constant 0 : index
    %178 = vector.load %arg7[%c0_210, %c0_211] : memref<1x32xf32, #tpu.memory_space<vmem>>, vector<1x32xf32>
    %c0_212 = arith.constant 0 : index
    %c0_213 = arith.constant 0 : index
    %179 = vector.load %arg8[%c0_212, %c0_213] : memref<1x32xf32, #tpu.memory_space<vmem>>, vector<1x32xf32>
    %cst_214 = arith.constant dense<0.000000e+00> : vector<32xf32>
    %180 = vector.multi_reduction <add>, %177, %cst_214 [0] : vector<4x32xf32> to vector<32xf32>
    %181 = vector.shape_cast %180 : vector<32xf32> to vector<1x32xf32>
    %cst_215 = arith.constant 4.000000e+00 : f32
    %182 = vector.broadcast %cst_215 : f32 to vector<1x32xf32>
    %183 = arith.divf %181, %182 : vector<1x32xf32>
    %184 = vector.broadcast %183 : vector<1x32xf32> to vector<4x32xf32>
    %185 = arith.subf %177, %184 : vector<4x32xf32>
    %186 = arith.mulf %185, %185 : vector<4x32xf32>
    %cst_216 = arith.constant dense<0.000000e+00> : vector<32xf32>
    %187 = vector.multi_reduction <add>, %186, %cst_216 [0] : vector<4x32xf32> to vector<32xf32>
    %188 = vector.shape_cast %187 : vector<32xf32> to vector<1x32xf32>
    %cst_217 = arith.constant 4.000000e+00 : f32
    %189 = vector.broadcast %cst_217 : f32 to vector<1x32xf32>
    %190 = arith.divf %188, %189 : vector<1x32xf32>
    %191 = vector.broadcast %183 : vector<1x32xf32> to vector<4x32xf32>
    %192 = arith.subf %177, %191 : vector<4x32xf32>
    %cst_218 = arith.constant 9.99999974E-6 : f32
    %193 = vector.broadcast %cst_218 : f32 to vector<1x32xf32>
    %194 = arith.addf %190, %193 : vector<1x32xf32>
    %195 = math.rsqrt %194 : vector<1x32xf32>
    %196 = vector.broadcast %195 : vector<1x32xf32> to vector<4x32xf32>
    %197 = arith.mulf %192, %196 : vector<4x32xf32>
    %198 = vector.broadcast %178 : vector<1x32xf32> to vector<4x32xf32>
    %199 = arith.mulf %198, %197 : vector<4x32xf32>
    %200 = vector.broadcast %179 : vector<1x32xf32> to vector<4x32xf32>
    %201 = arith.addf %199, %200 : vector<4x32xf32>
    %cst_219 = arith.constant 2.000000e-01 : f32
    %202 = vector.broadcast %cst_219 : f32 to vector<4x32xf32>
    %203 = arith.mulf %202, %201 : vector<4x32xf32>
    %204 = arith.maximumf %201, %203 : vector<4x32xf32>
    %205 = vector.extract_strided_slice %204 {offsets = [0, 0], sizes = [2, 32], strides = [1, 1]} : vector<4x32xf32> to vector<2x32xf32>
    %c0_220 = arith.constant 0 : index
    %c0_221 = arith.constant 0 : index
    %206 = vector.load %arg13[%c0_220, %c0_221] : memref<2x64xf32, #tpu.memory_space<vmem>>, vector<2x32xf32>
    tpu.vector_store %arg13[%c0_220, %c0_221], %205 {strides = array<i32>} : memref<2x64xf32, #tpu.memory_space<vmem>>, vector<2x32xf32>,
    %207 = vector.extract_strided_slice %204 {offsets = [2, 0], sizes = [2, 32], strides = [1, 1]} : vector<4x32xf32> to vector<2x32xf32>
    %c0_222 = arith.constant 0 : index
    %c32_223 = arith.constant 32 : index
    %208 = vector.load %arg13[%c0_222, %c32_223] : memref<2x64xf32, #tpu.memory_space<vmem>>, vector<2x32xf32>
    tpu.vector_store %arg13[%c0_222, %c32_223], %207 {strides = array<i32>} : memref<2x64xf32, #tpu.memory_space<vmem>>, vector<2x32xf32>,
    %c0_224 = arith.constant 0 : index
    %c0_225 = arith.constant 0 : index
    %209 = vector.load %arg13[%c0_224, %c0_225] : memref<2x64xf32, #tpu.memory_space<vmem>>, vector<2x64xf32>
    %c0_226 = arith.constant 0 : index
    %c0_227 = arith.constant 0 : index
    %210 = vector.load %arg4[%c0_226, %c0_227] : memref<64x32xf32, #tpu.memory_space<vmem>>, vector<64x32xf32>
    %cst_228 = arith.constant dense<0.000000e+00> : vector<2x32xf32>
    %211 = tpu.matmul %209, %210, %cst_228 {dimension_numbers = #tpu.dot_dimension_numbers<[1], [0], [0], [1], [0, 0, 1, 1], [], []>} : vector<2x64xf32>, vector<64x32xf32>, vector<2x32xf32> -> vector<2x32xf32>
    %cst_229 = arith.constant 1.000000e+00 : f32
    %212 = vector.broadcast %cst_229 : f32 to vector<2x32xf32>
    %213 = arith.mulf %211, %212 : vector<2x32xf32>
    %c0_230 = arith.constant 0 : index
    %c0_231 = arith.constant 0 : index
    %214 = vector.load %arg9[%c0_230, %c0_231] : memref<2x32xf32, #tpu.memory_space<vmem>>, vector<2x32xf32>
    tpu.vector_store %arg9[%c0_230, %c0_231], %213 {strides = array<i32>} : memref<2x32xf32, #tpu.memory_space<vmem>>, vector<2x32xf32>,
    return
  }
}

</mosaic_0001>

<bundles_post_ra>
// kernel: encoder_forward.1
= control target key start
LH: loop header
LB: loop body
LE: loop exit
PB: predicated region body
PF: predicated region fallthrough
CT: control target
= control target key end

     0   :  { %s616_s13 = smov 4   ;;  %s617_s16 = smov 8   ;;  %s929_s0 = inlined_call_operand.vmem [shape: f32[16,2,4], index: 0, kind: input, shape index: {}]   ;;  %s930_s1 = inlined_call_operand.vmem [shape: f32[16,8], index: 1, kind: input, shape index: {}]   ;;  %s931_s2 = inlined_call_operand.vmem [shape: f32[32,16], index: 2, kind: input, shape index: {}]   ;;  %s932_s3 = inlined_call_operand.vmem [shape: f32[64,32], index: 3, kind: input, shape index: {}]   ;;  %s933_s4 = inlined_call_operand.vmem [shape: f32[64,32], index: 4, kind: input, shape index: {}]   ;;  %s934_s5 = inlined_call_operand.vmem [shape: f32[1,16], index: 5, kind: input, shape index: {}]   ;;  %s935_s6 = inlined_call_operand.vmem [shape: f32[1,16], index: 6, kind: input, shape index: {}]   ;;  %s936_s7 = inlined_call_operand.vmem [shape: f32[1,32], index: 7, kind: input, shape index: {}]   ;;  %s937_s8 = inlined_call_operand.vmem [shape: f32[1,32], index: 8, kind: input, shape index: {}]   ;;  %s938_s9 = inlined_call_operand.hbm [shape: f32[2,32], index: 9, kind: output, shape index: {}]  }
   0x1   :  { %v540_v0 = vld [vmem:[%s929_s0 + $0x8] sm:$0x3]  ;;  %v35_v1 = vld [vmem:[%s929_s0] sm:$0x3]  ;;  %v533_v2 = vld [vmem:[%s929_s0 + $0x2] sm:$0x3] }
   0x2   :  { %84 = vrot.lane.b32.xlu1 %v540_v0, %s616_s13  ;;  %37 = vrot.lane.b32.xlu0 %v35_v1, %s616_s13  ;;  %v544_v3 = vld [vmem:[%s929_s0 + $0xc] sm:$0x3]  ;;  %v536_v4 = vld [vmem:[%s929_s0 + $0x4] sm:$0x3] }
   0x3   :  { %45 = vrot.lane.b32.xlu2 %v533_v2, %s617_s16 }
   0x4   :  { %14 = vsyncpa [#allocation7], 0  ;;  %v537_v5 = vld [vmem:[%s929_s0 + $0x6] sm:$0x3]  ;;  %v545_v6 = vld [vmem:[%s929_s0 + $0xe] sm:$0x3] }
   0x5   :  { %v541_v7 = vld [vmem:[%s929_s0 + $0xa] sm:$0x3]  ;;  %v534_v8 = vld [vmem:[%s929_s0 + $0x4] sm:$0x3]  ;;  %s618_s29 = smov 12   ;;  %vm33_vm0 = vcmask 25600  }
   0x6   :  { %v542_v9 = vld [vmem:[%s929_s0 + $0xc] sm:$0x3]  ;;  %v538_v10 = vld [vmem:[%s929_s0 + $0x8] sm:$0x3]  ;;  %v546_v11 = vld [vmem:[%s929_s0 + $0x10] sm:$0x3] }
   0x7   :  { %v552_v12 = vld [vmem:[%s929_s0 + $0x14] sm:$0x3]  ;;  %v548_v13 = vld [vmem:[%s929_s0 + $0x10] sm:$0x3]  ;;  %v556_v14 = vld [vmem:[%s929_s0 + $0x18] sm:$0x3] }
   0x8   :  { %v549_v15 = vld [vmem:[%s929_s0 + $0x12] sm:$0x3]  ;;  %v560_v16 = vld [vmem:[%s929_s0 + $0x1c] sm:$0x3]  ;;  %v553_v17 = vld [vmem:[%s929_s0 + $0x16] sm:$0x3] }
   0x9   :  { %v561_v18 = vld [vmem:[%s929_s0 + $0x1e] sm:$0x3]  ;;  %v557_v19 = vld [vmem:[%s929_s0 + $0x1a] sm:$0x3]  ;;  %v550_v20 = vld [vmem:[%s929_s0 + $0x14] sm:$0x3] }
   0xa   :  { %106 = vrot.lane.b32.xlu1 %v544_v3, %s616_s13  ;;  %62 = vrot.lane.b32.xlu0 %v536_v4, %s616_s13  ;;  %v558_v21 = vld [vmem:[%s929_s0 + $0x1c] sm:$0x3]  ;;  %v554_v22 = vld [vmem:[%s929_s0 + $0x18] sm:$0x3]  ;;  %v619_v24 = vmov 0.0   ;;  %vm40_vm1 = vcmask 58400  }
   0xb   :  { %69 = vrot.lane.b32.xlu2 %v537_v5, %s617_s16  ;;  %v539_v23 = vld [vmem:[%s929_s0 + $0x6] sm:$0x3]  ;;  %34 = vst.msk [vmem:[#allocation2] sm:$0x3] %vm33_vm0, %v619_v24  ;;  %v543_v25 = vld [vmem:[%s929_s0 + $0xa] sm:$0x3] }
   0xc   :  { %81 = vst.msk [vmem:[#allocation2 + $0x4] sm:$0x3] %vm33_vm0, %v539_v23  ;;  %v535_v26 = vld [vmem:[%s929_s0 + $0x2] sm:$0x3]  ;;  %v209_v30 = vld [vmem:[%s930_s1 + $0x8] sm:$0xff]  ;;  %vm48_vm2 = vcmask 91200  }
   0xd   :  { %103 = vst.msk [vmem:[#allocation2 + $0x6] sm:$0x3] %vm33_vm0, %v543_v25  ;;  %v208_v31 = vld [vmem:[%s930_s1] sm:$0xff]  ;;  %v551_v32 = vld [vmem:[%s929_s0 + $0x12] sm:$0x3]  ;;  %231 = vmatpush.msra.mxu0 %v209_v30  ;;  %vm56_vm3 = vcmask 124000  }
   0xe   :  { %59 = vst.msk [vmem:[#allocation2 + $0x2] sm:$0x3] %vm33_vm0, %v535_v26  ;;  %v547_v36 = vld [vmem:[%s929_s0 + $0xe] sm:$0x3]  ;;  %v555_v37 = vld [vmem:[%s929_s0 + $0x16] sm:$0x3] }
   0xf   :  { %147 = vst.msk [vmem:[#allocation2 + $0xa] sm:$0x3] %vm33_vm0, %v551_v32  ;;  %232 = vmatpush.msra.mxu0 %v208_v31  ;;  %v559_v41 = vld [vmem:[%s929_s0 + $0x1a] sm:$0x3]  ;;  %vm210_vm4 = vcmask 130048   ;;  %vm262_vm5 = vcmask 60418  }
  0x10   :  { %125 = vst.msk [vmem:[#allocation2 + $0x8] sm:$0x3] %vm33_vm0, %v547_v36  ;;  %vm274_vm6 = vcmask 64518   ;;  %s620_s0 = smov 16   ;;  %vm244_vm7 = vcmask 58368   ;;  %s621_s17 = smov 24  }
  0x11   :  { %169 = vst.msk [vmem:[#allocation2 + $0xc] sm:$0x3] %vm33_vm0, %v555_v37  ;;  %vm250_vm8 = vcmask 123968   ;;  %vm264_vm9 = vcmask 128068   ;;  %vm255_vm10 = vcmask 191618   ;;  %vm266_vm11 = vcmask 195718  }
  0x12   :  { %113 = vrot.lane.b32.xlu1 %v545_v6, %s617_s16  ;;  %91 = vrot.lane.b32.xlu0 %v541_v7, %s617_s16  ;;  %191 = vst.msk [vmem:[#allocation2 + $0xe] sm:$0x3] %vm33_vm0, %v559_v41  ;;  %v293_v2 = vld [vmem:[%s931_s2 + $0x18] sm:$0xff]  ;;  %v292_v3 = vld [vmem:[%s931_s2 + $0x10] sm:$0xff]  ;;  %vm272_vm12 = vcmask 255168   ;;  %vm260_vm13 = vcmask 259268  }
  0x13   :  { %53 = vrot.lane.b32.xlu2 %v534_v8, %s618_s29  ;;  %245 = vst.msk [vmem:[#allocation3] sm:$0x3] %vm244_vm7, %v619_v24  ;;  %310 = vmatpush.msra.mxu1 %v293_v2  ;;  %v291_v4 = vld [vmem:[%s931_s2 + $0x8] sm:$0xff]  ;;  %v290_v5 = vld [vmem:[%s931_s2] sm:$0xff]  ;;  %vm294_vm14 = vcmask 261120   ;;  %vm367_vm0 = vcmask 123904  }
  0x14   :  { %368 = vst.msk [vmem:[#allocation4] sm:$0x3] %vm367_vm0, %v619_v24  ;;  %s623_s27 = smov 48   ;;  %s624_s28 = smov 32   ;;  %vm378_vm7 = vcmask 388354  }
  0x15   :  { %311 = vmatpush.msra.mxu1 %v292_v3 }
  0x17   :  { %312 = vmatpush.msra.mxu1 %v291_v4 }
  0x19   :  { %313 = vmatpush.msra.mxu1 %v290_v5 }
  0x1a   :  { %98 = vrot.lane.b32.xlu1 %v542_v9, %s618_s29  ;;  %76 = vrot.lane.b32.xlu0 %v538_v10, %s618_s29 }
  0x1b   :  { %120 = vrot.lane.b32.xlu2 %v546_v11, %s618_s29  ;;  %v622_v11 = vmov 8.0  }
  0x1c   :  { %582 = vrcp.f32 %v622_v11 }
  0x22   :  { %150 = vrot.lane.b32.xlu1 %v552_v12, %s616_s13  ;;  %128 = vrot.lane.b32.xlu0 %v548_v13, %s616_s13  ;;  %v583_v12 = vpop.eup %582 }
  0x23   :  { %172 = vrot.lane.b32.xlu2 %v556_v14, %s616_s13  ;;  %v328_v13 = vmul.f32 8.0, %v583_v12  ;;  %vm332_vm15 = vweird.f32 %v583_v12 }
  0x25   :  { %v329_v14 = vsub.f32 1.0, %v328_v13 }
  0x2a   :  { %135 = vrot.lane.b32.xlu1 %v549_v15, %s617_s16  ;;  %194 = vrot.lane.b32.xlu0 %v560_v16, %s616_s13 }
  0x2b   :  { %157 = vrot.lane.b32.xlu2 %v553_v17, %s617_s16 }
  0x32   :  { %201 = vrot.lane.b32.xlu1 %v561_v18, %s617_s16  ;;  %179 = vrot.lane.b32.xlu0 %v557_v19, %s617_s16  ;;  %v330_v18 = vmul.f32 %v583_v12, %v329_v14 }
  0x33   :  { %142 = vrot.lane.b32.xlu2 %v550_v20, %s618_s29 }
  0x3a   :  { %186 = vrot.lane.b32.xlu1 %v558_v21, %s618_s29  ;;  %164 = vrot.lane.b32.xlu0 %v554_v22, %s618_s29  ;;  %v331_v21 = vadd.f32 %v583_v12, %v330_v18 }
  0x3c   :  { %v333_v25 = vsel %vm332_vm15, %v583_v12, %v331_v21 }
  0x5d   :  { %v46_v27 = vpop.permute.xlu2 %45 }
  0x65   :  { %v70_v28 = vpop.permute.xlu2 %69 }
  0x6d   :  { %v54_v29 = vpop.permute.xlu2 %53 }
  0x74   :  { %v85_v33 = vpop.permute.xlu1 %84  ;;  %v38_v34 = vpop.permute.xlu0 %37 }
  0x75   :  { %87 = vst.msk [vmem:[#allocation2 + $0x4] sm:$0x3] %vm40_vm1, %v85_v33  ;;  %v121_v35 = vpop.permute.xlu2 %120 }
  0x76   :  { %41 = vst.msk [vmem:[#allocation2] sm:$0x3] %vm40_vm1, %v38_v34 }
  0x77   :  { %49 = vst.msk [vmem:[#allocation2] sm:$0x3] %vm48_vm2, %v46_v27 }
  0x78   :  { %57 = vst.msk [vmem:[#allocation2] sm:$0x3] %vm56_vm3, %v54_v29 }
  0x7c   :  { %v107_v38 = vpop.permute.xlu1 %106  ;;  %v63_v39 = vpop.permute.xlu0 %62 }
  0x7d   :  { %109 = vst.msk [vmem:[#allocation2 + $0x6] sm:$0x3] %vm40_vm1, %v107_v38  ;;  %v173_v40 = vpop.permute.xlu2 %172 }
  0x7e   :  { %65 = vst.msk [vmem:[#allocation2 + $0x2] sm:$0x3] %vm40_vm1, %v63_v39 }
  0x7f   :  { %72 = vst.msk [vmem:[#allocation2 + $0x2] sm:$0x3] %vm48_vm2, %v70_v28 }
  0x80   :  { %175 = vst.msk [vmem:[#allocation2 + $0xc] sm:$0x3] %vm40_vm1, %v173_v40 }
  0x84   :  { %v114_v42 = vpop.permute.xlu1 %113  ;;  %v92_v43 = vpop.permute.xlu0 %91 }
  0x85   :  { %116 = vst.msk [vmem:[#allocation2 + $0x6] sm:$0x3] %vm48_vm2, %v114_v42  ;;  %v158_v46 = vpop.permute.xlu2 %157 }
  0x86   :  { %94 = vst.msk [vmem:[#allocation2 + $0x4] sm:$0x3] %vm48_vm2, %v92_v43 }
  0x87   :  { %123 = vst.msk [vmem:[#allocation2 + $0x6] sm:$0x3] %vm56_vm3, %v121_v35 }
  0x8c   :  { %v99_v44 = vpop.permute.xlu1 %98  ;;  %v77_v45 = vpop.permute.xlu0 %76 }
  0x8d   :  { %101 = vst.msk [vmem:[#allocation2 + $0x4] sm:$0x3] %vm56_vm3, %v99_v44  ;;  %v143_v50 = vpop.permute.xlu2 %142 }
  0x8e   :  { %79 = vst.msk [vmem:[#allocation2 + $0x2] sm:$0x3] %vm56_vm3, %v77_v45  ;;  %v578_v45 = vld [vmem:[%s934_s5] ss:$0 sm:$0xff] }
  0x94   :  { %v151_v47 = vpop.permute.xlu1 %150  ;;  %v129_v48 = vpop.permute.xlu0 %128 }
  0x95   :  { %153 = vst.msk [vmem:[#allocation2 + $0xa] sm:$0x3] %vm40_vm1, %v151_v47  ;;  %v206_v49 = vld [vmem:[#allocation2] sm:$0xff] }
  0x96   :  { %131 = vst.msk [vmem:[#allocation2 + $0x8] sm:$0x3] %vm40_vm1, %v129_v48  ;;  %562 = vmatmul.msk.f32.vlgmr.msra.gmra.mxu0 %vm210_vm4, %v206_v49  ;;  %v579_v48 = vld [vmem:[%s935_s6] ss:$0 sm:$0xff] }
  0x97   :  { %160 = vst.msk [vmem:[#allocation2 + $0xa] sm:$0x3] %vm48_vm2, %v158_v46 }
  0x9c   :  { %v136_v51 = vpop.permute.xlu1 %135  ;;  %v195_v52 = vpop.permute.xlu0 %194 }
  0x9d   :  { %138 = vst.msk [vmem:[#allocation2 + $0x8] sm:$0x3] %vm48_vm2, %v136_v51 }
  0x9e   :  { %197 = vst.msk [vmem:[#allocation2 + $0xe] sm:$0x3] %vm40_vm1, %v195_v52 }
  0x9f   :  { %145 = vst.msk [vmem:[#allocation2 + $0x8] sm:$0x3] %vm56_vm3, %v143_v50 }
  0xa4   :  { %v202_v53 = vpop.permute.xlu1 %201  ;;  %v180_v54 = vpop.permute.xlu0 %179 }
  0xa5   :  { %204 = vst.msk [vmem:[#allocation2 + $0xe] sm:$0x3] %vm48_vm2, %v202_v53  ;;  %v401_v53 = vld [vmem:[%s932_s3 + $0x38] sm:$0xff] }
  0xa6   :  { %205 = vst.msk [vmem:[#allocation2 + $0xe] sm:$0x3] %vm56_vm3, %v619_v24  ;;  %414 = vmatpush.msra.mxu2 %v401_v53 }
  0xa7   :  { %182 = vst.msk [vmem:[#allocation2 + $0xc] sm:$0x3] %vm48_vm2, %v180_v54  ;;  %v400_v54 = vld [vmem:[%s932_s3 + $0x30] sm:$0xff] }
  0xa8   :  { %415 = vmatpush.msra.mxu2 %v400_v54 }
  0xac   :  { %v187_v55 = vpop.permute.xlu1 %186  ;;  %v165_v56 = vpop.permute.xlu0 %164 }
  0xad   :  { %189 = vst.msk [vmem:[#allocation2 + $0xc] sm:$0x3] %vm56_vm3, %v187_v55  ;;  %v399_v55 = vld [vmem:[%s932_s3 + $0x28] sm:$0xff] }
  0xae   :  { %167 = vst.msk [vmem:[#allocation2 + $0xa] sm:$0x3] %vm56_vm3, %v165_v56  ;;  %416 = vmatpush.msra.mxu2 %v399_v55  ;;  %v398_v56 = vld [vmem:[%s932_s3 + $0x20] sm:$0xff] }
  0xb0   :  { %417 = vmatpush.msra.mxu2 %v398_v56 }
  0xb5   :  { %v207_v57 = vld [vmem:[#allocation2 + $0x8] sm:$0xff] }
  0xb6   :  { %563 = vmatmul.msk.f32.gmra.mxu0 %vm210_vm4, %v207_v57  ;;  %v397_v57 = vld [vmem:[%s932_s3 + $0x18] sm:$0xff] }
  0xb7   :  { %418 = vmatpush.msra.mxu2 %v397_v57 }
 0x113   :  { %v234_v58 = vpop.f32.mrf.mxu0 }
 0x114   :  { %v240_v59 = vmul.f32 0.2, %v234_v58 }
 0x116   :  { %v242_v60 = vmax.f32 %v234_v58, %v240_v59  ;;  %v396_v58 = vld [vmem:[%s932_s3 + $0x10] sm:$0xff]  ;;  %v395_v59 = vld [vmem:[%s932_s3 + $0x8] sm:$0xff] }
 0x117   :  { %419 = vmatpush.msra.mxu2 %v396_v58 }
 0x118   :  { %252 = vrot.lane.b32.xlu1 %v242_v60, %s620_s0  ;;  %247 = vrot.lane.b32.xlu2 %v242_v60, %s617_s16  ;;  %263 = vst.msk [vmem:[#allocation3] sm:$0xc] %vm262_vm5, %v242_v60 }
 0x119   :  { %275 = vst.msk [vmem:[#allocation3 - $0x2] sm:$0xc0] %vm274_vm6, %v242_v60  ;;  %vm387_vm6 = vcmask 259204   ;;  %420 = vmatpush.msra.mxu2 %v395_v59 }
 0x133   :  { %v237_v61 = vpop.f32.mrf.mxu0 }
 0x134   :  { %v241_v62 = vmul.f32 0.2, %v237_v61 }
 0x136   :  { %v243_v63 = vmax.f32 %v237_v61, %v241_v62  ;;  %v394_v61 = vld [vmem:[%s932_s3] sm:$0xff] }
 0x137   :  { %421 = vmatpush.msra.mxu2 %v394_v61 }
 0x138   :  { %269 = vrot.lane.b32.xlu1 %v243_v63, %s621_s17  ;;  %280 = vrot.lane.b32.xlu2 %v243_v63, %s620_s0  ;;  %285 = vst.msk [vmem:[#allocation3 + $0x4] sm:$0xc] %vm262_vm5, %v243_v63  ;;  %vm373_vm5 = vcmask 255104  }
 0x139   :  { %276 = vrot.lane.b32.xlu0 %v243_v63, %s617_s16 }
 0x141   :  { %257 = vrot.lane.b32.xlu0 %v242_v60, %s621_s17  ;;  %s524_s17 = sshll.u32 %s938_s9, 4  ;;  %s525_s17 = int_to_ptr.hbm [resolvable:$true] %s524_s17 }
 0x172   :  { %v248_v0 = vpop.permute.xlu2 %247 }
 0x173   :  { %251 = vst.msk [vmem:[#allocation3] sm:$0x3] %vm250_vm8, %v248_v0 }
 0x174   :  { %265 = vst.msk [vmem:[#allocation3 - $0x2] sm:$0x30] %vm264_vm9, %v248_v0 }
 0x18a   :  { %v253_v1 = vpop.permute.xlu1 %252 }
 0x18b   :  { %256 = vst.msk [vmem:[#allocation3 - $0x2] sm:$0xc] %vm255_vm10, %v253_v1 }
 0x18c   :  { %267 = vst.msk [vmem:[#allocation3 - $0x4] sm:$0xc0] %vm266_vm11, %v253_v1  ;;  %v625_v1 = vmov 4.0  }
 0x192   :  { %v281_v8 = vpop.permute.xlu2 %280 }
 0x1aa   :  { %v270_v6 = vpop.permute.xlu1 %269 }
 0x1ab   :  { %273 = vst.msk [vmem:[#allocation3 + $0x2] sm:$0x3] %vm272_vm12, %v270_v6  ;;  %v277_v7 = vpop.permute.xlu0 %276 }
 0x1ac   :  { %279 = vst.msk [vmem:[#allocation3 + $0x4] sm:$0x3] %vm250_vm8, %v277_v7  ;;  %vm383_vm8 = vcmask 521604  }
 0x1ad   :  { %283 = vst.msk [vmem:[#allocation3 + $0x2] sm:$0xc] %vm255_vm10, %v281_v8  ;;  %vm391_vm10 = vcmask 517504  }
 0x1ae   :  { %286 = vst.msk [vmem:[#allocation3 + $0x2] sm:$0x30] %vm264_vm9, %v277_v7  ;;  %vm389_vm9 = vcmask 392454  }
 0x1af   :  { %287 = vst.msk [vmem:[#allocation3] sm:$0xc0] %vm266_vm11, %v281_v8  ;;  %vm402_vm11 = vcmask 523264  }
 0x1b0   :  { %288 = vst.msk [vmem:[#allocation3 + $0x6] sm:$0x3] %vm272_vm12, %v619_v24  ;;  %vm428_vm12 = vcmask 257024  }
 0x1b1   :  { %284 = vst.msk [vmem:[#allocation3] sm:$0x30] %vm260_vm13, %v270_v6 }
 0x1b3   :  { %v258_v9 = vpop.permute.xlu0 %257 }
 0x1b4   :  { %261 = vst.msk [vmem:[#allocation3 - $0x4] sm:$0x30] %vm260_vm13, %v258_v9 }
 0x1bb   :  { %v289_v10 = vld [vmem:[#allocation3] sm:$0xff] }
 0x1bc   :  { %564 = vmatmul.msk.f32.vlgmr.msra.gmra.mxu1 %vm294_vm14, %v289_v10 }
 0x239   :  { %v315_v15 = vpop.f32.mrf.mxu1 }
 0x23a   :  { %v320_v16 = vsel %vm210_vm4, %v315_v15, 0.0 }
 0x23b   :  { %v321_v17 = vrot.slane %v320_v16, 4 }
 0x23d   :  { %v322_v19 = vadd.f32 %v321_v17, %v320_v16 }
 0x23f   :  { %v323_v20 = vrot.slane %v322_v19, 2 }
 0x241   :  { %v324_v22 = vadd.f32 %v323_v20, %v322_v19 }
 0x243   :  { %v325_v23 = vrot.slane %v324_v22, 1 }
 0x245   :  { %v326_v26 = vadd.f32 %v325_v23, %v324_v22 }
 0x247   :  { %v334_v27 = vmul.f32 %v333_v25, %v326_v26 }
 0x249   :  { %v335_v28 = vsub.f32 %v315_v15, %v334_v27  ;;  %v492_v27 = vld [vmem:[%s933_s4 + $0x38] sm:$0xff] }
 0x24a   :  { %504 = vmatpush.msra.mxu3 %v492_v27 }
 0x24b   :  { %v336_v29 = vmul.f32 %v335_v28, %v335_v28 }
 0x24d   :  { %v337_v30 = vsel %vm210_vm4, %v336_v29, 0.0  ;;  %vm385_vm4 = vcmask 125954  }
 0x24e   :  { %v338_v31 = vrot.slane %v337_v30, 4 }
 0x250   :  { %v339_v32 = vadd.f32 %v338_v31, %v337_v30  ;;  %v490_v30 = vld [vmem:[%s933_s4 + $0x28] sm:$0xff]  ;;  %v489_v31 = vld [vmem:[%s933_s4 + $0x20] sm:$0xff] }
 0x252   :  { %v340_v33 = vrot.slane %v339_v32, 2 }
 0x254   :  { %v341_v34 = vadd.f32 %v340_v33, %v339_v32 }
 0x256   :  { %v342_v35 = vrot.slane %v341_v34, 1 }
 0x258   :  { %v343_v36 = vadd.f32 %v342_v35, %v341_v34 }
 0x25a   :  { %v344_v37 = vmul.f32 %v343_v36, %v333_v25 }
 0x25c   :  { %v345_v38 = vadd.f32 1e-05, %v344_v37 }
 0x25e   :  { %584 = vrsqrt.f32 %v345_v38  ;;  %vm352_vm2 = vweird.f32 %v345_v38 }
 0x25f   :  { %586 = vrcp.f32 %v625_v1 }
 0x264   :  { %v585_v39 = vpop.eup %584 }
 0x265   :  { %v347_v40 = vmul.f32 %v585_v39, %v345_v38  ;;  %vm353_vm1 = vweird.f32 %v585_v39  ;;  %v587_v2 = vpop.eup %586  ;;  %v580_v38 = vld [vmem:[%s936_s7] ss:$0 sm:$0xff] }
 0x266   :  { %vm354_vm3 = vmor %vm352_vm2, %vm353_vm1  ;;  %v437_v3 = vmul.f32 4.0, %v587_v2  ;;  %vm441_vm13 = vweird.f32 %v587_v2  ;;  %vm476_vm1 = vcmask 254976   ;;  %vm482_vm2 = vcmask 519426  }
 0x267   :  { %v348_v41 = vmul.f32 %v585_v39, %v347_v40 }
 0x268   :  { %v438_v4 = vsub.f32 1.0, %v437_v3 }
 0x269   :  { %v349_v42 = vmul.f32 0.5, %v348_v41  ;;  %v581_v41 = vld [vmem:[%s937_s8] ss:$0 sm:$0xff] }
 0x26a   :  { %v439_v8 = vmul.f32 %v587_v2, %v438_v4 }
 0x26b   :  { %v350_v43 = vsub.f32 1.5, %v349_v42 }
 0x26c   :  { %v440_v11 = vadd.f32 %v587_v2, %v439_v8 }
 0x26d   :  { %v351_v44 = vmul.f32 %v585_v39, %v350_v43 }
 0x26e   :  { %v442_v13 = vsel %vm441_vm13, %v587_v2, %v440_v11 }
 0x26f   :  { %v355_v46 = vsel %vm354_vm3, %v585_v39, %v351_v44 }
 0x270   :  { %v356_v47 = vmul.f32 %v355_v46, %v335_v28  ;;  %v491_v28 = vld [vmem:[%s933_s4 + $0x30] sm:$0xff]  ;;  %v488_v46 = vld [vmem:[%s933_s4 + $0x18] sm:$0xff] }
 0x271   :  { %505 = vmatpush.msra.mxu3 %v491_v28 }
 0x272   :  { %v360_v49 = vmul.f32 %v578_v45, %v356_v47  ;;  %v487_v47 = vld [vmem:[%s933_s4 + $0x10] sm:$0xff] }
 0x273   :  { %506 = vmatpush.msra.mxu3 %v490_v30 }
 0x274   :  { %v364_v50 = vadd.f32 %v579_v48, %v360_v49  ;;  %v486_v48 = vld [vmem:[%s933_s4 + $0x8] sm:$0xff]  ;;  %v485_v49 = vld [vmem:[%s933_s4] sm:$0xff] }
 0x275   :  { %507 = vmatpush.msra.mxu3 %v489_v31 }
 0x276   :  { %v365_v51 = vmul.f32 0.2, %v364_v50 }
 0x277   :  { %508 = vmatpush.msra.mxu3 %v488_v46 }
 0x278   :  { %v366_v52 = vmax.f32 %v364_v50, %v365_v51 }
 0x279   :  { %509 = vmatpush.msra.mxu3 %v487_v47 }
 0x27a   :  { %380 = vrot.lane.b32.xlu1 %v366_v52, %s623_s27  ;;  %375 = vrot.lane.b32.xlu0 %v366_v52, %s624_s28  ;;  %386 = vst.msk [vmem:[#allocation4] sm:$0xc] %vm385_vm4, %v366_v52 }
 0x27b   :  { %370 = vrot.lane.b32.xlu2 %v366_v52, %s620_s0  ;;  %510 = vmatpush.msra.mxu3 %v486_v48 }
 0x27d   :  { %511 = vmatpush.msra.mxu3 %v485_v49 }
 0x2d5   :  { %v371_v60 = vpop.permute.xlu2 %370 }
 0x2d6   :  { %374 = vst.msk [vmem:[#allocation4] sm:$0x3] %vm373_vm5, %v371_v60 }
 0x2d7   :  { %388 = vst.msk [vmem:[#allocation4 - $0x2] sm:$0x30] %vm387_vm6, %v371_v60 }
 0x2ec   :  { %v381_v62 = vpop.permute.xlu1 %380  ;;  %v376_v63 = vpop.permute.xlu0 %375 }
 0x2ed   :  { %379 = vst.msk [vmem:[#allocation4 - $0x2] sm:$0xc] %vm378_vm7, %v376_v63 }
 0x2ee   :  { %384 = vst.msk [vmem:[#allocation4 - $0x4] sm:$0x30] %vm383_vm8, %v381_v62 }
 0x2ef   :  { %390 = vst.msk [vmem:[#allocation4 - $0x4] sm:$0xc0] %vm389_vm9, %v376_v63 }
 0x2f0   :  { %392 = vst.msk [vmem:[#allocation4 + $0x2] sm:$0x3] %vm391_vm10, %v619_v24 }
 0x2f7   :  { %v393_v0 = vld [vmem:[#allocation4] sm:$0xf] }
 0x2f8   :  { %565 = vmatmul.msk.f32.vlgmr.msra.gmra.mxu2 %vm402_vm11, %v393_v0 }
 0x37b   :  { %v423_v5 = vpop.f32.mrf.mxu2 }
 0x37c   :  { %v429_v6 = vsel %vm428_vm12, %v423_v5, 0.0 }
 0x37d   :  { %v430_v7 = vrot.slane %v429_v6, 4 }
 0x37f   :  { %v431_v9 = vadd.f32 %v430_v7, %v429_v6 }
 0x381   :  { %v432_v10 = vrot.slane %v431_v9, 2 }
 0x383   :  { %v433_v12 = vadd.f32 %v432_v10, %v431_v9 }
 0x385   :  { %v434_v24 = vrot.slane %v433_v12, 1 }
 0x387   :  { %v435_v14 = vadd.f32 %v434_v24, %v433_v12 }
 0x389   :  { %v443_v15 = vmul.f32 %v442_v13, %v435_v14 }
 0x38b   :  { %v444_v16 = vsub.f32 %v423_v5, %v443_v15 }
 0x38d   :  { %v445_v17 = vmul.f32 %v444_v16, %v444_v16 }
 0x38f   :  { %v446_v18 = vsel %vm428_vm12, %v445_v17, 0.0 }
 0x390   :  { %v447_v19 = vrot.slane %v446_v18, 4 }
 0x392   :  { %v448_v20 = vadd.f32 %v447_v19, %v446_v18 }
 0x394   :  { %v449_v21 = vrot.slane %v448_v20, 2 }
 0x396   :  { %v450_v22 = vadd.f32 %v449_v21, %v448_v20 }
 0x398   :  { %v451_v23 = vrot.slane %v450_v22, 1 }
 0x39a   :  { %v452_v25 = vadd.f32 %v451_v23, %v450_v22 }
 0x39c   :  { %v453_v26 = vmul.f32 %v452_v25, %v442_v13 }
 0x39e   :  { %v454_v29 = vadd.f32 1e-05, %v453_v26 }
 0x3a0   :  { %588 = vrsqrt.f32 %v454_v29  ;;  %vm461_vm15 = vweird.f32 %v454_v29 }
 0x3a6   :  { %v589_v32 = vpop.eup %588 }
 0x3a7   :  { %v456_v33 = vmul.f32 %v589_v32, %v454_v29  ;;  %vm462_vm14 = vweird.f32 %v589_v32 }
 0x3a8   :  { %vm463_vm0 = vmor %vm461_vm15, %vm462_vm14 }
 0x3a9   :  { %v457_v34 = vmul.f32 %v589_v32, %v456_v33 }
 0x3ab   :  { %v458_v35 = vmul.f32 0.5, %v457_v34 }
 0x3ad   :  { %v459_v36 = vsub.f32 1.5, %v458_v35 }
 0x3af   :  { %v460_v37 = vmul.f32 %v589_v32, %v459_v36 }
 0x3b1   :  { %v464_v39 = vsel %vm463_vm0, %v589_v32, %v460_v37 }
 0x3b2   :  { %v465_v40 = vmul.f32 %v464_v39, %v444_v16 }
 0x3b4   :  { %v469_v42 = vmul.f32 %v580_v38, %v465_v40 }
 0x3b6   :  { %v473_v43 = vadd.f32 %v581_v41, %v469_v42 }
 0x3b8   :  { %v474_v44 = vmul.f32 0.2, %v473_v43 }
 0x3ba   :  { %v475_v45 = vmax.f32 %v473_v43, %v474_v44 }
 0x3bc   :  { %479 = vrot.lane.b32.xlu2 %v475_v45, %s624_s28  ;;  %477 = vst.msk [vmem:[#allocation5] sm:$0x3] %vm476_vm1, %v475_v45  ;;  %s626_s28 = smov [#allocation6]  }
 0x3bd   :  { %s522_s15 = sshll.u32 %s626_s28, 4  ;;  %s523_s15 = int_to_ptr.vmem [resolvable:$true] %s522_s15 }
 0x416   :  { %v480_v50 = vpop.permute.xlu2 %479 }
 0x417   :  { %483 = vst.msk [vmem:[#allocation5 - $0x2] sm:$0xc] %vm482_vm2, %v480_v50 }
 0x41e   :  { %v484_v51 = vld [vmem:[#allocation5] sm:$0x3] }
 0x41f   :  { %566 = vmatmul.msk.f32.vlgmr.msra.gmra.mxu3 %vm402_vm11, %v484_v51 }
 0x4a2   :  { %v513_v52 = vpop.f32.mrf.mxu3 }
 0x4a3   :  { %516 = vst.msk [vmem:[#allocation6] sm:$0x3] %vm476_vm1, %v513_v52 }
 0x4a4   :  { %527 = dma.vmem_to_hbm [thread:$0]  %s523_s15, 32, %s525_s17, [#allocation7]  }
 0x4a5   :  { %614 = dma.done.wait [#allocation7], 32  }
 0x4a6   :  { %615 = vsyncadd [#allocation7], 4294967264 }
 0x4a7   :  { %532 = vsyncpa [#allocation7], 1 }

</bundles_post_ra>
